<compile_context>
chip_gen: v7x
topology: tpu7x:2x2x1
jax: 0.10.0
libtpu: 0.0.40
codegen_flags: <defaults>
</compile_context>

<pallas_src>
import jax
import jax.numpy as jnp
from jax.experimental import pallas as pl
from jax.experimental.pallas import tpu as pltpu


# ---------------------------------------------------------------------------
# Kernel
# ---------------------------------------------------------------------------
def _lenet300_kernel(x_ref, w1_ref, b1_ref, w2_ref, b2_ref, w3_ref, b3_ref, o_ref):
    # fc1 + ReLU   (bf16 x bf16 -> f32 accumulate on the MXU)
    h1 = jnp.dot(x_ref[...], w1_ref[...], preferred_element_type=jnp.float32)
    h1 = jnp.maximum(h1 + b1_ref[...], 0.0).astype(jnp.bfloat16)
    # fc2 + ReLU
    h2 = jnp.dot(h1, w2_ref[...], preferred_element_type=jnp.float32)
    h2 = jnp.maximum(h2 + b2_ref[...], 0.0).astype(jnp.bfloat16)
    # fc3 (logits, no activation) -- lane-dense 128-wide f32 store
    h3 = jnp.dot(h2, w3_ref[...], preferred_element_type=jnp.float32)
    o_ref[...] = (h3 + b3_ref[...]).astype(o_ref.dtype)


# ---------------------------------------------------------------------------
# Parameter preparation (one-time, outside the per-call path)
# ---------------------------------------------------------------------------
def _round_up(n, m):
    return ((n + m - 1) // m) * m


def prepare_params(params):
    """Transpose PyTorch (out,in) weights to (in,out), zero-pad every feature
    dim to a multiple of 128, cast weights to bf16 and biases to f32 (1, out)."""
    def prep_layer(w, b):
        wt = jnp.asarray(w).T.astype(jnp.float32)             # (in, out)
        fin, fout = wt.shape
        fin_p, fout_p = _round_up(fin, 128), _round_up(fout, 128)
        wt = jnp.pad(wt, ((0, fin_p - fin), (0, fout_p - fout)))
        bp = jnp.pad(jnp.asarray(b).astype(jnp.float32), (0, fout_p - fout))
        return wt.astype(jnp.bfloat16), bp[None, :]

    w1, b1 = prep_layer(params["fc1_w"], params["fc1_b"])     # (896, 384), (1, 384)
    w2, b2 = prep_layer(params["fc2_w"], params["fc2_b"])     # (384, 128), (1, 128)
    w3, b3 = prep_layer(params["fc3_w"], params["fc3_b"])     # (128, 128), (1, 128)
    return {
        "w1": w1, "b1": b1, "w2": w2, "b2": b2, "w3": w3, "b3": b3,
        "in_features": int(params["fc1_w"].shape[1]),
        "n_classes": int(params["fc3_w"].shape[0]),
    }


# ---------------------------------------------------------------------------
# Forward
# ---------------------------------------------------------------------------
def lenet300_forward(x, prepped, batch_tile=256):
    """x: (B, C, H, W) or (B, in_features). prepped: output of prepare_params()."""
    w1, b1 = prepped["w1"], prepped["b1"]
    w2, b2 = prepped["w2"], prepped["b2"]
    w3, b3 = prepped["w3"], prepped["b3"]
    n_classes = prepped["n_classes"]

    K1 = w1.shape[0]          # padded input features (896)
    NOUT = w3.shape[1]        # padded logits width (128)

    B = x.shape[0]
    x2 = x.reshape(B, -1).astype(jnp.bfloat16)                 # x.view(B, -1), bf16 DMA
    in_feat = x2.shape[1]

    # Batch tile: 256 matches the v6e/v7x MXU height; clamp (to a multiple of 8)
    # for tiny batches so the sublane constraint holds.
    TB = max(8, min(batch_tile, _round_up(B, 8)))
    B_pad = _round_up(B, TB)

    # Zero-pad batch rows and feature lanes (zeros contribute nothing to the dots).
    x2 = jnp.pad(x2, ((0, B_pad - B), (0, K1 - in_feat)))

    grid = (B_pad // TB,)
    const = lambda a: pl.BlockSpec(a.shape, lambda i: (0,) * a.ndim)

    out = pl.pallas_call(
        _lenet300_kernel,
        out_shape=jax.ShapeDtypeStruct((B_pad, NOUT), jnp.float32),
        grid=grid,
        in_specs=[
            pl.BlockSpec((TB, K1), lambda i: (i, 0)),   # x tile (pipelined)
            const(w1), const(b1),                       # weights/biases stay resident
            const(w2), const(b2),
            const(w3), const(b3),
        ],
        out_specs=pl.BlockSpec((TB, NOUT), lambda i: (i, 0)),
        compiler_params=pltpu.CompilerParams(
            dimension_semantics=("parallel",),          # batch tiles over TCs (v7x)
        ),
    )(x2, w1, b1, w2, b2, w3, b3)

    return out[:B, :n_classes]


# ---------------------------------------------------------------------------
# Synthetic params / reference
# ---------------------------------------------------------------------------
def init_params(key, in_features=784, n_classes=10):
    """Deterministic synthetic parameters in PyTorch nn.Linear layout (out, in)."""
    ks = jax.random.split(key, 6)

    def linear_init(kw, kb, fan_in, fan_out):
        bound = 1.0 / jnp.sqrt(jnp.float32(fan_in))
        w = jax.random.uniform(kw, (fan_out, fan_in), jnp.float32, -bound, bound)
        b = jax.random.uniform(kb, (fan_out,), jnp.float32, -bound, bound)
        return w, b

    w1, b1 = linear_init(ks[0], ks[1], in_features, 300)
    w2, b2 = linear_init(ks[2], ks[3], 300, 100)
    w3, b3 = linear_init(ks[4], ks[5], 100, n_classes)
    return {"fc1_w": w1, "fc1_b": b1,
            "fc2_w": w2, "fc2_b": b2,
            "fc3_w": w3, "fc3_b": b3}


def reference_forward(x, params):
    B = x.shape[0]
    h = x.reshape(B, -1).astype(jnp.float32)
    h = jnp.maximum(h @ params["fc1_w"].T + params["fc1_b"], 0.0)
    h = jnp.maximum(h @ params["fc2_w"].T + params["fc2_b"], 0.0)
    return h @ params["fc3_w"].T + params["fc3_b"]


if __name__ == "__main__":
    key = jax.random.PRNGKey(0)
    kp, kx = jax.random.split(key)

    in_features, n_classes, batch = 784, 10, 2
    params = init_params(kp, in_features, n_classes)
    prepped = prepare_params(params)          # one-time transpose / pad / bf16 cast

    # MNIST-like NCHW input (2, 1, 28, 28) -> flattened to 784 inside forward.
    x = jax.random.normal(kx, (batch, 1, 28, 28), jnp.float32)

    fwd = jax.jit(lambda xx: lenet300_forward(xx, prepped))
    out = jax.block_until_ready(fwd(x))

    ref = reference_forward(x, params)
    assert out.shape == (batch, n_classes)
    # bf16 matmul inputs -> relaxed tolerance vs the f32 reference.
    assert jnp.allclose(out, ref, atol=5e-2, rtol=5e-2), (
        float(jnp.max(jnp.abs(out - ref))))

    print("KERNEL_OK")
</pallas_src>

<mosaic_0001>
module attributes {stable_mosaic.version = 11 : i64} {
  func.func @_lenet300_kernel(%arg0: i32, %arg1: memref<8x896xbf16, #tpu.memory_space<vmem>>, %arg2: memref<896x384xbf16, #tpu.memory_space<vmem>>, %arg3: memref<1x384xf32, #tpu.memory_space<vmem>>, %arg4: memref<384x128xbf16, #tpu.memory_space<vmem>>, %arg5: memref<1x128xf32, #tpu.memory_space<vmem>>, %arg6: memref<128x128xbf16, #tpu.memory_space<vmem>>, %arg7: memref<1x128xf32, #tpu.memory_space<vmem>>, %arg8: memref<8x128xf32, #tpu.memory_space<vmem>>) attributes {dimension_semantics = [#tpu.dimension_semantics<parallel>], iteration_bounds = array<i64: 1>, scalar_prefetch = 0 : i64, scratch_operands = 0 : i64, tpu.core_type = #tpu.core_type<tc>, window_params = [{transform_indices = @transform_0, window_bounds = array<i64: 8, 896>}, {pipeline_mode = #tpu.pipeline_mode<synchronous>, transform_indices = @transform_1, window_bounds = array<i64: 896, 384>}, {pipeline_mode = #tpu.pipeline_mode<synchronous>, transform_indices = @transform_2, window_bounds = array<i64: 1, 384>}, {pipeline_mode = #tpu.pipeline_mode<synchronous>, transform_indices = @transform_3, window_bounds = array<i64: 384, 128>}, {pipeline_mode = #tpu.pipeline_mode<synchronous>, transform_indices = @transform_4, window_bounds = array<i64: 1, 128>}, {pipeline_mode = #tpu.pipeline_mode<synchronous>, transform_indices = @transform_5, window_bounds = array<i64: 128, 128>}, {pipeline_mode = #tpu.pipeline_mode<synchronous>, transform_indices = @transform_6, window_bounds = array<i64: 1, 128>}, {transform_indices = @transform_7, window_bounds = array<i64: 8, 128>}]} {
    %c0 = arith.constant 0 : index
    %c0_0 = arith.constant 0 : index
    %0 = vector.load %arg1[%c0, %c0_0] : memref<8x896xbf16, #tpu.memory_space<vmem>>, vector<8x896xbf16>
    %c0_1 = arith.constant 0 : index
    %c0_2 = arith.constant 0 : index
    %1 = vector.load %arg2[%c0_1, %c0_2] : memref<896x384xbf16, #tpu.memory_space<vmem>>, vector<896x384xbf16>
    %cst = arith.constant dense<0.000000e+00> : vector<8x384xf32>
    %2 = tpu.matmul %0, %1, %cst {dimension_numbers = #tpu.dot_dimension_numbers<[1], [0], [0], [1], [0, 0, 1, 1], [], []>} : vector<8x896xbf16>, vector<896x384xbf16>, vector<8x384xf32> -> vector<8x384xf32>
    %c0_3 = arith.constant 0 : index
    %c0_4 = arith.constant 0 : index
    %3 = vector.load %arg3[%c0_3, %c0_4] : memref<1x384xf32, #tpu.memory_space<vmem>>, vector<1x384xf32>
    %4 = vector.broadcast %3 : vector<1x384xf32> to vector<8x384xf32>
    %5 = arith.addf %2, %4 : vector<8x384xf32>
    %cst_5 = arith.constant 0.000000e+00 : f32
    %6 = vector.broadcast %cst_5 : f32 to vector<8x384xf32>
    %7 = arith.maximumf %5, %6 : vector<8x384xf32>
    %8 = arith.truncf %7 : vector<8x384xf32> to vector<8x384xbf16>
    %c0_6 = arith.constant 0 : index
    %c0_7 = arith.constant 0 : index
    %9 = vector.load %arg4[%c0_6, %c0_7] : memref<384x128xbf16, #tpu.memory_space<vmem>>, vector<384x128xbf16>
    %cst_8 = arith.constant dense<0.000000e+00> : vector<8x128xf32>
    %10 = tpu.matmul %8, %9, %cst_8 {dimension_numbers = #tpu.dot_dimension_numbers<[1], [0], [0], [1], [0, 0, 1, 1], [], []>} : vector<8x384xbf16>, vector<384x128xbf16>, vector<8x128xf32> -> vector<8x128xf32>
    %c0_9 = arith.constant 0 : index
    %c0_10 = arith.constant 0 : index
    %11 = vector.load %arg5[%c0_9, %c0_10] : memref<1x128xf32, #tpu.memory_space<vmem>>, vector<1x128xf32>
    %12 = vector.broadcast %11 : vector<1x128xf32> to vector<8x128xf32>
    %13 = arith.addf %10, %12 : vector<8x128xf32>
    %cst_11 = arith.constant 0.000000e+00 : f32
    %14 = vector.broadcast %cst_11 : f32 to vector<8x128xf32>
    %15 = arith.maximumf %13, %14 : vector<8x128xf32>
    %16 = arith.truncf %15 : vector<8x128xf32> to vector<8x128xbf16>
    %c0_12 = arith.constant 0 : index
    %c0_13 = arith.constant 0 : index
    %17 = vector.load %arg6[%c0_12, %c0_13] : memref<128x128xbf16, #tpu.memory_space<vmem>>, vector<128x128xbf16>
    %cst_14 = arith.constant dense<0.000000e+00> : vector<8x128xf32>
    %18 = tpu.matmul %16, %17, %cst_14 {dimension_numbers = #tpu.dot_dimension_numbers<[1], [0], [0], [1], [0, 0, 1, 1], [], []>} : vector<8x128xbf16>, vector<128x128xbf16>, vector<8x128xf32> -> vector<8x128xf32>
    %c0_15 = arith.constant 0 : index
    %c0_16 = arith.constant 0 : index
    %19 = vector.load %arg7[%c0_15, %c0_16] : memref<1x128xf32, #tpu.memory_space<vmem>>, vector<1x128xf32>
    %20 = vector.broadcast %19 : vector<1x128xf32> to vector<8x128xf32>
    %21 = arith.addf %18, %20 : vector<8x128xf32>
    %c0_17 = arith.constant 0 : index
    %c0_18 = arith.constant 0 : index
    %22 = vector.load %arg8[%c0_17, %c0_18] : memref<8x128xf32, #tpu.memory_space<vmem>>, vector<8x128xf32>
    tpu.vector_store %arg8[%c0_17, %c0_18], %21 {strides = array<i32>} : memref<8x128xf32, #tpu.memory_space<vmem>>, vector<8x128xf32>,
    return
  }
  func.func @transform_0(%arg0: i32) -> (i32, i32) {
    %c0_i32 = arith.constant 0 : i32
    %c0_i32_0 = arith.constant 0 : i32
    return %arg0, %c0_i32 : i32, i32
  }
  func.func @transform_1(%arg0: i32) -> (i32, i32) {
    %c0_i32 = arith.constant 0 : i32
    %c0_i32_0 = arith.constant 0 : i32
    %c0_i32_1 = arith.constant 0 : i32
    return %c0_i32, %c0_i32_0 : i32, i32
  }
  func.func @transform_2(%arg0: i32) -> (i32, i32) {
    %c0_i32 = arith.constant 0 : i32
    %c0_i32_0 = arith.constant 0 : i32
    %c0_i32_1 = arith.constant 0 : i32
    return %c0_i32, %c0_i32_0 : i32, i32
  }
  func.func @transform_3(%arg0: i32) -> (i32, i32) {
    %c0_i32 = arith.constant 0 : i32
    %c0_i32_0 = arith.constant 0 : i32
    %c0_i32_1 = arith.constant 0 : i32
    return %c0_i32, %c0_i32_0 : i32, i32
  }
  func.func @transform_4(%arg0: i32) -> (i32, i32) {
    %c0_i32 = arith.constant 0 : i32
    %c0_i32_0 = arith.constant 0 : i32
    %c0_i32_1 = arith.constant 0 : i32
    return %c0_i32, %c0_i32_0 : i32, i32
  }
  func.func @transform_5(%arg0: i32) -> (i32, i32) {
    %c0_i32 = arith.constant 0 : i32
    %c0_i32_0 = arith.constant 0 : i32
    %c0_i32_1 = arith.constant 0 : i32
    return %c0_i32, %c0_i32_0 : i32, i32
  }
  func.func @transform_6(%arg0: i32) -> (i32, i32) {
    %c0_i32 = arith.constant 0 : i32
    %c0_i32_0 = arith.constant 0 : i32
    %c0_i32_1 = arith.constant 0 : i32
    return %c0_i32, %c0_i32_0 : i32, i32
  }
  func.func @transform_7(%arg0: i32) -> (i32, i32) {
    %c0_i32 = arith.constant 0 : i32
    %c0_i32_0 = arith.constant 0 : i32
    return %arg0, %c0_i32 : i32, i32
  }
}

</mosaic_0001>

<bundles_post_ra>
// kernel: _lambda_.1
= control target key start
LH: loop header
LB: loop body
LE: loop exit
PB: predicated region body
PF: predicated region fallthrough
CT: control target
= control target key end

     0   :  { %vm2585_vm0 = vmmov 0   ;;  %s3297_s1 = inlined_call_operand.vmem [shape: bf16[896,384], index: 1, kind: input, shape index: {}]   ;;  %s3298_s0 = inlined_call_operand.vmem [shape: bf16[8,896], index: 0, kind: input, shape index: {}]   ;;  %s3299_s3 = inlined_call_operand.vmem [shape: bf16[384,128], index: 3, kind: input, shape index: {}]   ;;  %s3300_s2 = inlined_call_operand.vmem [shape: f32[1,384], index: 2, kind: input, shape index: {}]   ;;  %s3301_s5 = inlined_call_operand.vmem [shape: bf16[128,128], index: 5, kind: input, shape index: {}]   ;;  %s3302_s4 = inlined_call_operand.vmem [shape: f32[1,128], index: 4, kind: input, shape index: {}]   ;;  %s3303_s6 = inlined_call_operand.vmem [shape: f32[1,128], index: 6, kind: input, shape index: {}]   ;;  %s3304_s7 = inlined_call_operand.vmem [shape: f32[8,128], index: 7, kind: output, shape index: {}]  }
   0x1   :  { %v2321_v0 = vld [vmem:[%s3297_s1 + $0x4] ss:$12 sps:$4 sm:$0xff]   ;;  %v2323_v1 = vld [vmem:[%s3297_s1] ss:$12 sps:$4 sm:$0xff]   ;;  %v2324_v2 = vld [vmem:[%s3297_s1 + $0x1c] ss:$12 sps:$4 sm:$0xff]  }
   0x2   :  { %1193 = vmatprep.subr.bf16.mxu0 %v2321_v0  ;;  %v2326_v3 = vld [vmem:[%s3297_s1 + $0x18] ss:$12 sps:$4 sm:$0xff]   ;;  %v2327_v4 = vld [vmem:[%s3297_s1 + $0x34] ss:$12 sps:$4 sm:$0xff]   ;;  %v2329_v5 = vld [vmem:[%s3297_s1 + $0x30] ss:$12 sps:$4 sm:$0xff]  }
   0x3   :  { %1194 = vmatpush1.bf16.msra.mxu0 %v2323_v1  ;;  %v2330_v6 = vld [vmem:[%s3297_s1 + $0x4c] ss:$12 sps:$4 sm:$0xff]   ;;  %v2332_v7 = vld [vmem:[%s3297_s1 + $0x48] ss:$12 sps:$4 sm:$0xff]   ;;  %v2333_v8 = vld [vmem:[%s3297_s1 + $0x64] ss:$12 sps:$4 sm:$0xff]  }
   0x4   :  { %1195 = vmatprep.subr.bf16.mxu0 %v2324_v2  ;;  %v2335_v9 = vld [vmem:[%s3297_s1 + $0x60] ss:$12 sps:$4 sm:$0xff]   ;;  %v2336_v10 = vld [vmem:[%s3297_s1 + $0x7c] ss:$12 sps:$4 sm:$0xff]   ;;  %v2338_v13 = vld [vmem:[%s3297_s1 + $0x78] ss:$12 sps:$4 sm:$0xff]  }
   0x5   :  { %v2354_v11 = vld [vmem:[%s3297_s1 + $0xc8] ss:$12 sps:$4 sm:$0xff]   ;;  %v2359_v14 = vld [vmem:[%s3297_s1 + $0xe0] ss:$12 sps:$4 sm:$0xff]   ;;  %v2341_v17 = vld [vmem:[%s3297_s1 + $0x90] ss:$12 sps:$4 sm:$0xff]  }
   0x6   :  { %v2355_v12 = vld [vmem:[%s3297_s1 + $0x8] ss:$12 sps:$4 sm:$0xff]   ;;  %2129 = vmatprep.subr.bf16.mxu1 %v2354_v11  ;;  %v2360_v15 = vld [vmem:[%s3297_s1 + $0x20] ss:$12 sps:$4 sm:$0xff]   ;;  %v2364_v18 = vld [vmem:[%s3297_s1 + $0xf8] ss:$12 sps:$4 sm:$0xff]  }
   0x7   :  { %1196 = vmatpush1.bf16.msra.mxu0 %v2326_v3  ;;  %2130 = vmatpush3.bf16.msra.mxu1 %v2355_v12  ;;  %v2339_v16 = vld [vmem:[%s3297_s1 + $0x94] ss:$12 sps:$4 sm:$0xff]   ;;  %v2365_v19 = vld [vmem:[%s3297_s1 + $0x38] ss:$12 sps:$4 sm:$0xff]   ;;  %v2369_v21 = vld [vmem:[%s3297_s1 + $0x110] ss:$12 sps:$4 sm:$0xff]  }
   0x8   :  { %1197 = vmatprep.subr.bf16.mxu0 %v2327_v4  ;;  %2131 = vmatprep.subr.bf16.mxu1 %v2359_v14  ;;  %v2342_v20 = vld [vmem:[%s3297_s1 + $0xac] ss:$12 sps:$4 sm:$0xff]   ;;  %v2370_v22 = vld [vmem:[%s3297_s1 + $0x50] ss:$12 sps:$4 sm:$0xff]   ;;  %v2344_v23 = vld [vmem:[%s3297_s1 + $0xa8] ss:$12 sps:$4 sm:$0xff]  }
   0x9   :  { %v2345_v24 = vld [vmem:[%s3297_s1 + $0xc4] ss:$12 sps:$4 sm:$0xff]   ;;  %v2374_v25 = vld [vmem:[%s3297_s1 + $0x128] ss:$12 sps:$4 sm:$0xff]   ;;  %v2347_v26 = vld [vmem:[%s3297_s1 + $0xc0] ss:$12 sps:$4 sm:$0xff]  }
   0xa   :  { %v2375_v27 = vld [vmem:[%s3297_s1 + $0x68] ss:$12 sps:$4 sm:$0xff]   ;;  %v2379_v29 = vld [vmem:[%s3297_s1 + $0x140] ss:$12 sps:$4 sm:$0xff]   ;;  %v2350_v31 = vld [vmem:[%s3297_s1 + $0xd8] ss:$12 sps:$4 sm:$0xff]  }
   0xb   :  { %1198 = vmatpush1.bf16.msra.mxu0 %v2329_v5  ;;  %2132 = vmatpush3.bf16.msra.mxu1 %v2360_v15  ;;  %v2348_v28 = vld [vmem:[%s3297_s1 + $0xdc] ss:$12 sps:$4 sm:$0xff]   ;;  %v27_v30 = vld [vmem:[%s3298_s0] sm:$0xff]  ;;  %v2356_v39 = vld [vmem:[%s3297_s1 + $0x10c] ss:$12 sps:$4 sm:$0xff]  }
   0xc   :  { %1199 = vmatprep.subr.bf16.mxu0 %v2330_v6  ;;  %2133 = vmatprep.subr.bf16.mxu1 %v2364_v18  ;;  %v2380_v32 = vld [vmem:[%s3297_s1 + $0x80] ss:$12 sps:$4 sm:$0xff]   ;;  %v1921_v33 = vcombine.high %v27_v30, %v27_v30  ;;  %v2386_v34 = vld [vmem:[%s3297_s1 + $0x158] ss:$12 sps:$4 sm:$0xff]   ;;  %v2353_v36 = vld [vmem:[%s3297_s1 + $0xf0] ss:$12 sps:$4 sm:$0xff]   ;;  %v1920_v46 = vcombine.low %v27_v30, %v27_v30 }
   0xd   :  { %v2351_v35 = vld [vmem:[%s3297_s1 + $0xf4] ss:$12 sps:$4 sm:$0xff]   ;;  %v2387_v37 = vld [vmem:[%s3297_s1 + $0x98] ss:$12 sps:$4 sm:$0xff]   ;;  %v2391_v38 = vld [vmem:[%s3297_s1 + $0x170] ss:$12 sps:$4 sm:$0xff]  }
   0xe   :  { %1225 = vmatprep.mubr.bf16.mxu0 %v1921_v33  ;;  %1389 = vmatprep.mubr.bf16.mxu1 %v1921_v33  ;;  %v2358_v40 = vld [vmem:[%s3297_s1 + $0x108] ss:$12 sps:$4 sm:$0xff]   ;;  %v2392_v41 = vld [vmem:[%s3297_s1 + $0xb0] ss:$12 sps:$4 sm:$0xff]   ;;  %v2363_v44 = vld [vmem:[%s3297_s1 + $0x120] ss:$12 sps:$4 sm:$0xff]  }
   0xf   :  { %1200 = vmatpush1.bf16.msra.mxu0 %v2332_v7  ;;  %2134 = vmatpush3.bf16.msra.mxu1 %v2365_v19  ;;  %v2396_v42 = vld [vmem:[%s3297_s1 + $0x248] ss:$12 sps:$4 sm:$0xff]   ;;  %v2361_v43 = vld [vmem:[%s3297_s1 + $0x124] ss:$12 sps:$4 sm:$0xff]   ;;  %v2401_v47 = vld [vmem:[%s3297_s1 + $0x260] ss:$12 sps:$4 sm:$0xff]  }
  0x10   :  { %1201 = vmatprep.subr.bf16.mxu0 %v2333_v8  ;;  %2135 = vmatprep.subr.bf16.mxu1 %v2369_v21  ;;  %v2397_v45 = vld [vmem:[%s3297_s1 + $0x188] ss:$12 sps:$4 sm:$0xff]   ;;  %v2402_v49 = vld [vmem:[%s3297_s1 + $0x1a0] ss:$12 sps:$4 sm:$0xff]   ;;  %v2368_v50 = vld [vmem:[%s3297_s1 + $0x138] ss:$12 sps:$4 sm:$0xff]  }
  0x11   :  { %v2366_v48 = vld [vmem:[%s3297_s1 + $0x13c] ss:$12 sps:$4 sm:$0xff]   ;;  %v2406_v51 = vld [vmem:[%s3297_s1 + $0x278] ss:$12 sps:$4 sm:$0xff]   ;;  %v2371_v52 = vld [vmem:[%s3297_s1 + $0x154] ss:$12 sps:$4 sm:$0xff]  }
  0x12   :  { %v2373_v53 = vld [vmem:[%s3297_s1 + $0x150] ss:$12 sps:$4 sm:$0xff]   ;;  %v2407_v54 = vld [vmem:[%s3297_s1 + $0x1b8] ss:$12 sps:$4 sm:$0xff]   ;;  %v2378_v57 = vld [vmem:[%s3297_s1 + $0x168] ss:$12 sps:$4 sm:$0xff]  }
  0x13   :  { %1202 = vmatpush1.bf16.msra.mxu0 %v2335_v9  ;;  %2136 = vmatpush3.bf16.msra.mxu1 %v2370_v22  ;;  %v2411_v55 = vld [vmem:[%s3297_s1 + $0x290] ss:$12 sps:$4 sm:$0xff]   ;;  %v2376_v56 = vld [vmem:[%s3297_s1 + $0x16c] ss:$12 sps:$4 sm:$0xff]   ;;  %v2416_v59 = vld [vmem:[%s3297_s1 + $0x2a8] ss:$12 sps:$4 sm:$0xff]  }
  0x14   :  { %1203 = vmatprep.subr.bf16.mxu0 %v2336_v10  ;;  %2137 = vmatprep.subr.bf16.mxu1 %v2374_v25  ;;  %v2412_v58 = vld [vmem:[%s3297_s1 + $0x1d0] ss:$12 sps:$4 sm:$0xff]   ;;  %v2383_v61 = vld [vmem:[%s3297_s1 + $0x180] ss:$12 sps:$4 sm:$0xff]   ;;  %v2417_v62 = vld [vmem:[%s3297_s1 + $0x1e8] ss:$12 sps:$4 sm:$0xff]  }
  0x15   :  { %v2385_v60 = vld [vmem:[%s3297_s1 + $0x184] ss:$12 sps:$4 sm:$0xff]   ;;  %v2421_v63 = vld [vmem:[%s3297_s1 + $0x2c0] ss:$12 sps:$4 sm:$0xff]   ;;  %v2390_v0 = vld [vmem:[%s3297_s1 + $0x19c] ss:$12 sps:$4 sm:$0xff]  }
  0x16   :  { %v2388_v1 = vld [vmem:[%s3297_s1 + $0x198] ss:$12 sps:$4 sm:$0xff]   ;;  %v2422_v2 = vld [vmem:[%s3297_s1 + $0x200] ss:$12 sps:$4 sm:$0xff]   ;;  %v2393_v8 = vld [vmem:[%s3297_s1 + $0x1b0] ss:$12 sps:$4 sm:$0xff]  }
  0x17   :  { %1204 = vmatpush1.bf16.msra.mxu0 %v2338_v13  ;;  %2138 = vmatpush3.bf16.msra.mxu1 %v2375_v27  ;;  %v2426_v3 = vld [vmem:[%s3297_s1 + $0x2d8] ss:$12 sps:$4 sm:$0xff]   ;;  %v2395_v4 = vld [vmem:[%s3297_s1 + $0x1b4] ss:$12 sps:$4 sm:$0xff]   ;;  %v28_v5 = vld [vmem:[%s3298_s0 + $0x8] sm:$0xff] }
  0x18   :  { %1205 = vmatprep.subr.bf16.mxu0 %v2339_v16  ;;  %2139 = vmatprep.subr.bf16.mxu1 %v2379_v29  ;;  %v1923_v6 = vcombine.high %v28_v5, %v28_v5  ;;  %v2427_v7 = vld [vmem:[%s3297_s1 + $0x218] ss:$12 sps:$4 sm:$0xff]   ;;  %v2431_v9 = vld [vmem:[%s3297_s1 + $0x2f0] ss:$12 sps:$4 sm:$0xff]   ;;  %v2398_v11 = vld [vmem:[%s3297_s1 + $0x1c8] ss:$12 sps:$4 sm:$0xff]   ;;  %v2855_v15 = vcombine.low %v28_v5, %v28_v5 }
  0x19   :  { %v2400_v10 = vld [vmem:[%s3297_s1 + $0x1cc] ss:$12 sps:$4 sm:$0xff]   ;;  %v2432_v12 = vld [vmem:[%s3297_s1 + $0x230] ss:$12 sps:$4 sm:$0xff]   ;;  %v2438_v13 = vld [vmem:[%s3297_s1 + $0x3c8] ss:$12 sps:$4 sm:$0xff]  }
  0x1a   :  { %v2405_v14 = vld [vmem:[%s3297_s1 + $0x1e4] ss:$12 sps:$4 sm:$0xff]   ;;  %v2403_v16 = vld [vmem:[%s3297_s1 + $0x1e0] ss:$12 sps:$4 sm:$0xff]   ;;  %v2410_v19 = vld [vmem:[%s3297_s1 + $0x1fc] ss:$12 sps:$4 sm:$0xff]  }
  0x1b   :  { %1206 = vmatpush1.bf16.msra.mxu0 %v2341_v17  ;;  %2140 = vmatpush3.bf16.msra.mxu1 %v2380_v32  ;;  %v2439_v17 = vld [vmem:[%s3297_s1 + $0x308] ss:$12 sps:$4 sm:$0xff]   ;;  %v2443_v18 = vld [vmem:[%s3297_s1 + $0x3e0] ss:$12 sps:$4 sm:$0xff]   ;;  %v2448_v22 = vld [vmem:[%s3297_s1 + $0x3f8] ss:$12 sps:$4 sm:$0xff]  }
  0x1c   :  { %1207 = vmatprep.subr.bf16.mxu0 %v2342_v20  ;;  %2141 = vmatprep.subr.bf16.mxu1 %v2386_v34  ;;  %v2408_v20 = vld [vmem:[%s3297_s1 + $0x1f8] ss:$12 sps:$4 sm:$0xff]   ;;  %v2444_v21 = vld [vmem:[%s3297_s1 + $0x320] ss:$12 sps:$4 sm:$0xff]   ;;  %v2418_v29 = vld [vmem:[%s3297_s1 + $0x228] ss:$12 sps:$4 sm:$0xff]  }
  0x1d   :  { %v2449_v25 = vld [vmem:[%s3297_s1 + $0x338] ss:$12 sps:$4 sm:$0xff]   ;;  %v2458_v30 = vld [vmem:[%s3297_s1 + $0x428] ss:$12 sps:$4 sm:$0xff]   ;;  %v2423_v32 = vld [vmem:[%s3297_s1 + $0x240] ss:$12 sps:$4 sm:$0xff]  }
  0x1e   :  { %v2420_v27 = vld [vmem:[%s3297_s1 + $0x22c] ss:$12 sps:$4 sm:$0xff]   ;;  %v2459_v33 = vld [vmem:[%s3297_s1 + $0x368] ss:$12 sps:$4 sm:$0xff]  }
  0x1f   :  { %1208 = vmatpush1.bf16.msra.mxu0 %v2344_v23  ;;  %2142 = vmatpush3.bf16.msra.mxu1 %v2387_v37  ;;  %v2415_v23 = vld [vmem:[%s3297_s1 + $0x214] ss:$12 sps:$4 sm:$0xff]   ;;  %v2504_v5 = vld [vmem:[%s3297_s1 + $0x518] ss:$12 sps:$4 sm:$0xff]  }
  0x20   :  { %1209 = vmatprep.subr.bf16.mxu0 %v2345_v24  ;;  %2143 = vmatprep.subr.bf16.mxu1 %v2391_v38  ;;  %v2413_v24 = vld [vmem:[%s3297_s1 + $0x210] ss:$12 sps:$4 sm:$0xff]   ;;  %v2463_v34 = vld [vmem:[%s3297_s1 + $0x440] ss:$12 sps:$4 sm:$0xff]   ;;  %v2428_v38 = vld [vmem:[%s3297_s1 + $0x258] ss:$12 sps:$4 sm:$0xff]  }
  0x23   :  { %1210 = vmatpush1.bf16.msra.mxu0 %v2347_v26  ;;  %2144 = vmatpush3.bf16.msra.mxu1 %v2392_v41  ;;  %v2453_v26 = vld [vmem:[%s3297_s1 + $0x410] ss:$12 sps:$4 sm:$0xff]   ;;  %v2435_v41 = vld [vmem:[%s3297_s1 + $0x274] ss:$12 sps:$4 sm:$0xff]  }
  0x24   :  { %1211 = vmatprep.subr.bf16.mxu0 %v2348_v28  ;;  %2151 = vmatprep.subr.bf16.mxu1 %v2396_v42  ;;  %v2454_v28 = vld [vmem:[%s3297_s1 + $0x350] ss:$12 sps:$4 sm:$0xff]  }
  0x25   :  { %v2433_v42 = vld [vmem:[%s3297_s1 + $0x270] ss:$12 sps:$4 sm:$0xff]  }
  0x26   :  { %1390 = vmatmul.mubr.bf16.vlgmr.msra.gmra.mrb[0].mxu1 %v1920_v46 }
  0x27   :  { %1212 = vmatpush1.bf16.msra.mxu0 %v2350_v31  ;;  %2152 = vmatpush3.bf16.msra.mxu1 %v2397_v45  ;;  %v2425_v31 = vld [vmem:[%s3297_s1 + $0x244] ss:$12 sps:$4 sm:$0xff]   ;;  %v2442_v45 = vld [vmem:[%s3297_s1 + $0x28c] ss:$12 sps:$4 sm:$0xff]  }
  0x28   :  { %1213 = vmatprep.subr.bf16.mxu0 %v2351_v35  ;;  %2153 = vmatprep.subr.bf16.mxu1 %v2401_v47  ;;  %v29_v35 = vld [vmem:[%s3298_s0 + $0x10] sm:$0xff] }
  0x29   :  { %1429 = vmatprep.mubr.bf16.mxu1 %v1923_v6  ;;  %v2921_v37 = vcombine.high %v29_v35, %v29_v35  ;;  %v2440_v47 = vld [vmem:[%s3297_s1 + $0x288] ss:$12 sps:$4 sm:$0xff]  }
  0x2b   :  { %1214 = vmatpush1.bf16.msra.mxu0 %v2353_v36  ;;  %2154 = vmatpush3.bf16.msra.mxu1 %v2402_v49  ;;  %v2430_v36 = vld [vmem:[%s3297_s1 + $0x25c] ss:$12 sps:$4 sm:$0xff]   ;;  %v2957_v49 = vcombine.low %v29_v35, %v29_v35  ;;  %v2530_v35 = vld [vmem:[%s3297_s1 + $0x484] ss:$12 sps:$4 sm:$0xff]  }
  0x2c   :  { %1215 = vmatprep.subr.bf16.mxu0 %v2356_v39  ;;  %2155 = vmatprep.subr.bf16.mxu1 %v2406_v51  ;;  %v2464_v39 = vld [vmem:[%s3297_s1 + $0x380] ss:$12 sps:$4 sm:$0xff]  }
  0x2d   :  { %v2445_v51 = vld [vmem:[%s3297_s1 + $0x2a0] ss:$12 sps:$4 sm:$0xff]  }
  0x2f   :  { %1216 = vmatpush1.bf16.msra.mxu0 %v2358_v40  ;;  %2156 = vmatpush3.bf16.msra.mxu1 %v2407_v54  ;;  %v2468_v40 = vld [vmem:[%s3297_s1 + $0x458] ss:$12 sps:$4 sm:$0xff]   ;;  %v2484_v54 = vld [vmem:[%s3297_s1 + $0x4a0] ss:$12 sps:$4 sm:$0xff]  }
  0x30   :  { %1217 = vmatprep.subr.bf16.mxu0 %v2361_v43  ;;  %2157 = vmatprep.subr.bf16.mxu1 %v2411_v55  ;;  %v2469_v43 = vld [vmem:[%s3297_s1 + $0x398] ss:$12 sps:$4 sm:$0xff]  }
  0x31   :  { %v2450_v55 = vld [vmem:[%s3297_s1 + $0x2b8] ss:$12 sps:$4 sm:$0xff]  }
  0x33   :  { %1218 = vmatpush1.bf16.msra.mxu0 %v2363_v44  ;;  %2158 = vmatpush3.bf16.msra.mxu1 %v2412_v58  ;;  %v2473_v44 = vld [vmem:[%s3297_s1 + $0x470] ss:$12 sps:$4 sm:$0xff]  }
  0x34   :  { %1219 = vmatprep.subr.bf16.mxu0 %v2366_v48  ;;  %2159 = vmatprep.subr.bf16.mxu1 %v2416_v59  ;;  %v2447_v48 = vld [vmem:[%s3297_s1 + $0x2a4] ss:$12 sps:$4 sm:$0xff]   ;;  %v2462_v59 = vld [vmem:[%s3297_s1 + $0x2ec] ss:$12 sps:$4 sm:$0xff]  }
  0x35   :  { %v2455_v58 = vld [vmem:[%s3297_s1 + $0x2d0] ss:$12 sps:$4 sm:$0xff]  }
  0x37   :  { %1220 = vmatpush1.bf16.msra.mxu0 %v2368_v50  ;;  %2160 = vmatpush3.bf16.msra.mxu1 %v2417_v62  ;;  %v2480_v50 = vld [vmem:[%s3297_s1 + $0x488] ss:$12 sps:$4 sm:$0xff]   ;;  %v2467_v62 = vld [vmem:[%s3297_s1 + $0x304] ss:$12 sps:$4 sm:$0xff]  }
  0x38   :  { %1221 = vmatprep.subr.bf16.mxu0 %v2371_v52  ;;  %2161 = vmatprep.subr.bf16.mxu1 %v2421_v63  ;;  %v2584_v52 = vmov 0.0   ;;  %v2496_v63 = vld [vmem:[%s3297_s1 + $0x4e8] ss:$12 sps:$4 sm:$0xff]  }
  0x3b   :  { %1222 = vmatpush1.bf16.msra.mxu0 %v2373_v53  ;;  %2162 = vmatpush3.bf16.msra.mxu1 %v2422_v2  ;;  %v2452_v53 = vld [vmem:[%s3297_s1 + $0x2bc] ss:$12 sps:$4 sm:$0xff]   ;;  %v2500_v2 = vld [vmem:[%s3297_s1 + $0x500] ss:$12 sps:$4 sm:$0xff]  }
  0x3c   :  { %1223 = vmatprep.subr.bf16.mxu0 %v2376_v56  ;;  %2163 = vmatprep.subr.bf16.mxu1 %v2426_v3  ;;  %v2457_v56 = vld [vmem:[%s3297_s1 + $0x2d4] ss:$12 sps:$4 sm:$0xff]   ;;  %v2470_v3 = vld [vmem:[%s3297_s1 + $0x318] ss:$12 sps:$4 sm:$0xff]  }
  0x3f   :  { %1224 = vmatpush1.bf16.msra.mxu0 %v2378_v57  ;;  %2164 = vmatpush3.bf16.msra.mxu1 %v2427_v7  ;;  %v2488_v57 = vld [vmem:[%s3297_s1 + $0x4b8] ss:$12 sps:$4 sm:$0xff]  }
  0x40   :  { %1234 = vmatprep.subr.bf16.mxu0 %v2385_v60  ;;  %2165 = vmatprep.subr.bf16.mxu1 %v2431_v9  ;;  %v2492_v60 = vld [vmem:[%s3297_s1 + $0x4d0] ss:$12 sps:$4 sm:$0xff]   ;;  %v2483_v7 = vld [vmem:[%s3297_s1 + $0x34c] ss:$12 sps:$4 sm:$0xff]   ;;  %v2481_v9 = vld [vmem:[%s3297_s1 + $0x348] ss:$12 sps:$4 sm:$0xff]  }
  0x42   :  { %1226 = vmatmul.mubr.bf16.vlgmr.msra.gmra.mrb[0].mxu0 %v1920_v46  ;;  %v2474_v46 = vld [vmem:[%s3297_s1 + $0x3b0] ss:$12 sps:$4 sm:$0xff]  }
  0x43   :  { %1235 = vmatpush1.bf16.msra.mxu0 %v2383_v61  ;;  %1266 = vmatprep.mubr.bf16.mxu0 %v1923_v6  ;;  %v2460_v61 = vld [vmem:[%s3297_s1 + $0x2e8] ss:$12 sps:$4 sm:$0xff]   ;;  %v2475_v6 = vld [vmem:[%s3297_s1 + $0x330] ss:$12 sps:$4 sm:$0xff]  }
  0x44   :  { %1236 = vmatprep.subr.bf16.mxu0 %v2390_v0  ;;  %2166 = vmatpush3.bf16.msra.mxu1 %v2432_v12  ;;  %v2465_v0 = vld [vmem:[%s3297_s1 + $0x300] ss:$12 sps:$4 sm:$0xff]  }
  0x45   :  { %2173 = vmatprep.subr.bf16.mxu1 %v2438_v13  ;;  %v2485_v12 = vld [vmem:[%s3297_s1 + $0x360] ss:$12 sps:$4 sm:$0xff]   ;;  %v2491_v13 = vld [vmem:[%s3297_s1 + $0x37c] ss:$12 sps:$4 sm:$0xff]  }
  0x47   :  { %1237 = vmatpush1.bf16.msra.mxu0 %v2388_v1  ;;  %1430 = vmatmul.mubr.bf16.vlgmr.msra.gmra.mrb[4].mxu1 %v2855_v15  ;;  %v2472_v1 = vld [vmem:[%s3297_s1 + $0x31c] ss:$12 sps:$4 sm:$0xff]  }
  0x48   :  { %1238 = vmatprep.subr.bf16.mxu0 %v2395_v4  ;;  %2174 = vmatpush3.bf16.msra.mxu1 %v2439_v17  ;;  %v2477_v4 = vld [vmem:[%s3297_s1 + $0x334] ss:$12 sps:$4 sm:$0xff]   ;;  %v2499_v17 = vld [vmem:[%s3297_s1 + $0x3ac] ss:$12 sps:$4 sm:$0xff]  }
  0x49   :  { %2175 = vmatprep.subr.bf16.mxu1 %v2443_v18  ;;  %1469 = vmatprep.mubr.bf16.mxu1 %v2921_v37  ;;  %v2497_v18 = vld [vmem:[%s3297_s1 + $0x3a8] ss:$12 sps:$4 sm:$0xff]  }
  0x4b   :  { %1239 = vmatpush1.bf16.msra.mxu0 %v2393_v8  ;;  %v2508_v8 = vld [vmem:[%s3297_s1 + $0x530] ss:$12 sps:$4 sm:$0xff]  }
  0x4c   :  { %1240 = vmatprep.subr.bf16.mxu0 %v2400_v10  ;;  %2176 = vmatpush3.bf16.msra.mxu1 %v2444_v21  ;;  %v2487_v10 = vld [vmem:[%s3297_s1 + $0x364] ss:$12 sps:$4 sm:$0xff]   ;;  %v2507_v21 = vld [vmem:[%s3297_s1 + $0x3dc] ss:$12 sps:$4 sm:$0xff]  }
  0x4d   :  { %2177 = vmatprep.subr.bf16.mxu1 %v2448_v22  ;;  %v2505_v22 = vld [vmem:[%s3297_s1 + $0x3d8] ss:$12 sps:$4 sm:$0xff]  }
  0x4f   :  { %1241 = vmatpush1.bf16.msra.mxu0 %v2398_v11  ;;  %v3047_v11 = vld [vmem:[%s3298_s0 + $0x18] ss:$0 sps:$4 sm:$0xff]  }
  0x50   :  { %1242 = vmatprep.subr.bf16.mxu0 %v2405_v14  ;;  %2178 = vmatpush3.bf16.msra.mxu1 %v2449_v25  ;;  %v2489_v14 = vld [vmem:[%s3297_s1 + $0x378] ss:$12 sps:$4 sm:$0xff]  }
  0x51   :  { %2179 = vmatprep.subr.bf16.mxu1 %v2453_v26  ;;  %v2515_v25 = vld [vmem:[%s3297_s1 + $0x40c] ss:$12 sps:$4 sm:$0xff]   ;;  %v2513_v26 = vld [vmem:[%s3297_s1 + $0x408] ss:$12 sps:$4 sm:$0xff]  }
  0x53   :  { %1243 = vmatpush1.bf16.msra.mxu0 %v2403_v16  ;;  %v2493_v16 = vld [vmem:[%s3297_s1 + $0x390] ss:$12 sps:$4 sm:$0xff]  }
  0x54   :  { %1244 = vmatprep.subr.bf16.mxu0 %v2410_v19  ;;  %2180 = vmatpush3.bf16.msra.mxu1 %v2454_v28  ;;  %v2503_v19 = vld [vmem:[%s3297_s1 + $0x3c4] ss:$12 sps:$4 sm:$0xff]   ;;  %v2516_v28 = vld [vmem:[%s3297_s1 + $0x420] ss:$12 sps:$4 sm:$0xff]  }
  0x55   :  { %2181 = vmatprep.subr.bf16.mxu1 %v2458_v30  ;;  %v2519_v30 = vld [vmem:[%s3297_s1 + $0x438] ss:$12 sps:$4 sm:$0xff]  }
  0x57   :  { %1245 = vmatpush1.bf16.msra.mxu0 %v2408_v20  ;;  %v2501_v20 = vld [vmem:[%s3297_s1 + $0x3c0] ss:$12 sps:$4 sm:$0xff]  }
  0x58   :  { %1246 = vmatprep.subr.bf16.mxu0 %v2415_v23  ;;  %2182 = vmatpush3.bf16.msra.mxu1 %v2459_v33  ;;  %v2511_v23 = vld [vmem:[%s3297_s1 + $0x3f4] ss:$12 sps:$4 sm:$0xff]   ;;  %v2527_v33 = vld [vmem:[%s3297_s1 + $0x46c] ss:$12 sps:$4 sm:$0xff]  }
  0x59   :  { %2183 = vmatprep.subr.bf16.mxu1 %v2463_v34  ;;  %v2525_v34 = vld [vmem:[%s3297_s1 + $0x468] ss:$12 sps:$4 sm:$0xff]  }
  0x5b   :  { %1247 = vmatpush1.bf16.msra.mxu0 %v2413_v24  ;;  %v2509_v24 = vld [vmem:[%s3297_s1 + $0x3f0] ss:$12 sps:$4 sm:$0xff]  }
  0x5c   :  { %1248 = vmatprep.subr.bf16.mxu0 %v2420_v27  ;;  %2184 = vmatpush3.bf16.msra.mxu1 %v2464_v39  ;;  %v2518_v27 = vld [vmem:[%s3297_s1 + $0x424] ss:$12 sps:$4 sm:$0xff]   ;;  %v2586_v39 = vmov 0  }
  0x5d   :  { %2185 = vmatprep.subr.bf16.mxu1 %v2468_v40  ;;  %v2536_v40 = vld [vmem:[%s3297_s1 + $0x4b4] ss:$12 sps:$4 sm:$0xff]  }
  0x5f   :  { %1249 = vmatpush1.bf16.msra.mxu0 %v2418_v29  ;;  %v2521_v29 = vld [vmem:[%s3297_s1 + $0x43c] ss:$12 sps:$4 sm:$0xff]  }
  0x60   :  { %1250 = vmatprep.subr.bf16.mxu0 %v2425_v31  ;;  %2186 = vmatpush3.bf16.msra.mxu1 %v2469_v43  ;;  %v2524_v31 = vld [vmem:[%s3297_s1 + $0x454] ss:$12 sps:$4 sm:$0xff]  }
  0x61   :  { %2187 = vmatprep.subr.bf16.mxu1 %v2473_v44  ;;  %v2537_v43 = vld [vmem:[%s3297_s1 + $0x4c8] ss:$12 sps:$4 sm:$0xff]   ;;  %v2542_v44 = vld [vmem:[%s3297_s1 + $0x4e4] ss:$12 sps:$4 sm:$0xff]  }
  0x63   :  { %1251 = vmatpush1.bf16.msra.mxu0 %v2423_v32  ;;  %v2522_v32 = vld [vmem:[%s3297_s1 + $0x450] ss:$12 sps:$4 sm:$0xff]  }
  0x64   :  { %1252 = vmatprep.subr.bf16.mxu0 %v2430_v36  ;;  %2188 = vmatpush3.bf16.msra.mxu1 %v2474_v46  ;;  %v2528_v36 = vld [vmem:[%s3297_s1 + $0x480] ss:$12 sps:$4 sm:$0xff]   ;;  %v2545_v46 = vld [vmem:[%s3297_s1 + $0x4fc] ss:$12 sps:$4 sm:$0xff]  }
  0x65   :  { %2244 = vmatprep.subr.bf16.mxu1 %v2584_v52 }
  0x67   :  { %1253 = vmatpush1.bf16.msra.mxu0 %v2428_v38  ;;  %1470 = vmatmul.mubr.bf16.vlgmr.msra.gmra.mrb[8].mxu1 %v2957_v49  ;;  %v2531_v38 = vld [vmem:[%s3297_s1 + $0x498] ss:$12 sps:$4 sm:$0xff]  }
  0x68   :  { %1254 = vmatprep.subr.bf16.mxu0 %v2435_v41  ;;  %2245 = vmatpush3.bf16.msra.mxu1 %v2480_v50  ;;  %v2534_v41 = vld [vmem:[%s3297_s1 + $0x4b0] ss:$12 sps:$4 sm:$0xff]   ;;  %v2551_v50 = vld [vmem:[%s3297_s1 + $0x52c] ss:$12 sps:$4 sm:$0xff]  }
  0x69   :  { %2260 = vmatprep.mubr.msk.bf16.mxu1 %vm2585_vm0, %v2584_v52  ;;  %2246 = vmatprep.subr.bf16.mxu1 %v2584_v52 }
  0x6b   :  { %1255 = vmatpush1.bf16.msra.mxu0 %v2433_v42  ;;  %v2539_v42 = vld [vmem:[%s3297_s1 + $0x4cc] ss:$12 sps:$4 sm:$0xff]  }
  0x6c   :  { %1256 = vmatprep.subr.bf16.mxu0 %v2442_v45  ;;  %2247 = vmatpush3.bf16.msra.mxu1 %v2484_v54  ;;  %v2540_v45 = vld [vmem:[%s3297_s1 + $0x4e0] ss:$12 sps:$4 sm:$0xff]  }
  0x6d   :  { %2248 = vmatprep.subr.bf16.mxu1 %v2584_v52  ;;  %v2553_v54 = vld [vmem:[%s3299_s3] sm:$0xff]  }
  0x6f   :  { %1257 = vmatpush1.bf16.msra.mxu0 %v2440_v47  ;;  %v2543_v47 = vld [vmem:[%s3297_s1 + $0x4f8] ss:$12 sps:$4 sm:$0xff]  }
  0x70   :  { %1258 = vmatprep.subr.bf16.mxu0 %v2447_v48  ;;  %2249 = vmatpush3.bf16.msra.mxu1 %v2488_v57  ;;  %v2548_v48 = vld [vmem:[%s3297_s1 + $0x514] ss:$12 sps:$4 sm:$0xff]  }
  0x71   :  { %2250 = vmatprep.subr.bf16.mxu1 %v2584_v52  ;;  %v2556_v57 = vld [vmem:[%s3299_s3 + $0x50] sm:$0xff]  }
  0x73   :  { %1259 = vmatpush1.bf16.msra.mxu0 %v2445_v51  ;;  %v2549_v51 = vld [vmem:[%s3297_s1 + $0x528] ss:$12 sps:$4 sm:$0xff]  }
  0x74   :  { %1260 = vmatprep.subr.bf16.mxu0 %v2452_v53  ;;  %2251 = vmatpush3.bf16.msra.mxu1 %v2492_v60  ;;  %v2552_v53 = vld [vmem:[%s3299_s3 + $0x40] sm:$0xff]   ;;  %v2559_v60 = vld [vmem:[%s3299_s3 + $0x18] sm:$0xff]  }
  0x75   :  { %2252 = vmatprep.subr.bf16.mxu1 %v2584_v52 }
  0x77   :  { %1261 = vmatpush1.bf16.msra.mxu0 %v2450_v55  ;;  %v2554_v55 = vld [vmem:[%s3299_s3 + $0x48] sm:$0xff]  }
  0x78   :  { %1262 = vmatprep.subr.bf16.mxu0 %v2457_v56  ;;  %2253 = vmatpush3.bf16.msra.mxu1 %v2496_v63  ;;  %v2555_v56 = vld [vmem:[%s3299_s3 + $0x8] sm:$0xff]  }
  0x79   :  { %2254 = vmatprep.subr.bf16.mxu1 %v2584_v52  ;;  %v2562_v63 = vld [vmem:[%s3299_s3 + $0x68] sm:$0xff]  }
  0x7b   :  { %1263 = vmatpush1.bf16.msra.mxu0 %v2455_v58  ;;  %v2557_v58 = vld [vmem:[%s3299_s3 + $0x10] sm:$0xff]  }
  0x7c   :  { %1264 = vmatprep.subr.bf16.mxu0 %v2462_v59  ;;  %2255 = vmatpush3.bf16.msra.mxu1 %v2500_v2  ;;  %v2558_v59 = vld [vmem:[%s3299_s3 + $0x58] sm:$0xff]  }
  0x7d   :  { %2256 = vmatprep.subr.bf16.mxu1 %v2584_v52 }
  0x7f   :  { %1265 = vmatpush1.bf16.msra.mxu0 %v2460_v61  ;;  %v2560_v61 = vld [vmem:[%s3299_s3 + $0x60] sm:$0xff]  }
  0x80   :  { %1275 = vmatprep.subr.bf16.mxu0 %v2467_v62  ;;  %2257 = vmatpush3.bf16.msra.mxu1 %v2504_v5  ;;  %v2561_v62 = vld [vmem:[%s3299_s3 + $0x20] sm:$0xff]  }
  0x81   :  { %2258 = vmatprep.subr.bf16.mxu1 %v2584_v52 }
  0x82   :  { %1267 = vmatmul.mubr.bf16.vlgmr.msra.gmra.mrb[0].mxu0 %v2855_v15  ;;  %v2495_v15 = vld [vmem:[%s3297_s1 + $0x394] ss:$12 sps:$4 sm:$0xff]  }
  0x83   :  { %1276 = vmatpush1.bf16.msra.mxu0 %v2465_v0  ;;  %1307 = vmatprep.mubr.bf16.mxu0 %v2921_v37  ;;  %v2533_v37 = vld [vmem:[%s3297_s1 + $0x49c] ss:$12 sps:$4 sm:$0xff]  }
  0x84   :  { %1277 = vmatprep.subr.bf16.mxu0 %v2472_v1  ;;  %2259 = vmatpush3.bf16.msra.mxu1 %v2508_v8  ;;  %v2563_v0 = vld [vmem:[%s3299_s3 + $0x28] sm:$0xff]  }
  0x85   :  { %2204 = vmatprep.subr.bf16.mxu1 %v2552_v53  ;;  %v2573_v53 = vld [vmem:[%s3299_s3 + $0xa8] sm:$0xff]  }
  0x87   :  { %1278 = vmatpush1.bf16.msra.mxu0 %v2470_v3  ;;  %2261 = vmatmul.mubr.bf16.vlgmr.msra.gmra.mrb[12].mxu1 %v3047_v11 }
  0x88   :  { %1279 = vmatprep.subr.bf16.mxu0 %v2477_v4  ;;  %2205 = vmatpush3.bf16.msra.mxu1 %v2553_v54  ;;  %v2574_v54 = vld [vmem:[%s3299_s3 + $0xb0] sm:$0xff]  }
  0x89   :  { %2206 = vmatprep.subr.bf16.mxu1 %v2554_v55  ;;  %v2575_v55 = vld [vmem:[%s3299_s3 + $0xb8] sm:$0xff]  }
  0x8b   :  { %1280 = vmatpush1.bf16.msra.mxu0 %v2475_v6  ;;  %v257_v6 = vlaneseq }
  0x8c   :  { %1281 = vmatprep.subr.bf16.mxu0 %v2483_v7  ;;  %2207 = vmatpush3.bf16.msra.mxu1 %v2555_v56 }
  0x8d   :  { %2208 = vmatprep.subr.bf16.mxu1 %v2556_v57  ;;  %v258_v7 = vshrl.u32 %v257_v6, 7 }
  0x8f   :  { %1282 = vmatpush1.bf16.msra.mxu0 %v2481_v9  ;;  %v267_v8 = vsub.s32 2, %v258_v7  ;;  %v255_v9 = vld [vmem:[%s3300_s2] sm:$0x7] }
  0x90   :  { %1283 = vmatprep.subr.bf16.mxu0 %v2487_v10  ;;  %2209 = vmatpush3.bf16.msra.mxu1 %v2557_v58  ;;  %v2576_v58 = vld [vmem:[%s3301_s5] sm:$0xff]  }
  0x91   :  { %2210 = vmatprep.subr.bf16.mxu1 %v2558_v59  ;;  %v268_v10 = vrot.slane %v255_v9, %v267_v8  ;;  %v2577_v59 = vld [vmem:[%s3301_s5 + $0x8] sm:$0xff]  }
  0x93   :  { %1284 = vmatpush1.bf16.msra.mxu0 %v2485_v12 }
  0x94   :  { %1285 = vmatprep.subr.bf16.mxu0 %v2491_v13  ;;  %2211 = vmatpush3.bf16.msra.mxu1 %v2559_v60  ;;  %v2578_v60 = vld [vmem:[%s3301_s5 + $0x10] sm:$0xff]  }
  0x95   :  { %2212 = vmatprep.subr.bf16.mxu1 %v2560_v61  ;;  %v2579_v61 = vld [vmem:[%s3301_s5 + $0x18] sm:$0xff]  }
  0x97   :  { %1286 = vmatpush1.bf16.msra.mxu0 %v2489_v14 }
  0x98   :  { %1287 = vmatprep.subr.bf16.mxu0 %v2495_v15  ;;  %2213 = vmatpush3.bf16.msra.mxu1 %v2561_v62  ;;  %v2580_v62 = vld [vmem:[%s3301_s5 + $0x20] sm:$0xff]  }
  0x99   :  { %2214 = vmatprep.subr.bf16.mxu1 %v2562_v63  ;;  %v2581_v63 = vld [vmem:[%s3301_s5 + $0x28] sm:$0xff]  }
  0x9b   :  { %1288 = vmatpush1.bf16.msra.mxu0 %v2493_v16 }
  0x9c   :  { %1289 = vmatprep.subr.bf16.mxu0 %v2499_v17  ;;  %2215 = vmatpush3.bf16.msra.mxu1 %v2563_v0  ;;  %v2582_v0 = vld [vmem:[%s3301_s5 + $0x30] sm:$0xff]  }
  0x9f   :  { %1290 = vmatpush1.bf16.msra.mxu0 %v2497_v18  ;;  %v2564_v18 = vld [vmem:[%s3299_s3 + $0x70] sm:$0xff]  }
  0xa0   :  { %1291 = vmatprep.subr.bf16.mxu0 %v2503_v19  ;;  %v2565_v19 = vld [vmem:[%s3299_s3 + $0x30] sm:$0xff]   ;;  %2216 = vmatprep.subr.bf16.mxu1 %v2564_v18 }
  0xa1   :  { %2217 = vmatpush3.bf16.msra.mxu1 %v2565_v19 }
  0xa3   :  { %1292 = vmatpush1.bf16.msra.mxu0 %v2501_v20  ;;  %v2566_v20 = vld [vmem:[%s3299_s3 + $0x78] sm:$0xff]  }
  0xa4   :  { %1293 = vmatprep.subr.bf16.mxu0 %v2507_v21  ;;  %v2567_v21 = vld [vmem:[%s3299_s3 + $0x38] sm:$0xff]   ;;  %2218 = vmatprep.subr.bf16.mxu1 %v2566_v20 }
  0xa5   :  { %2219 = vmatpush3.bf16.msra.mxu1 %v2567_v21 }
  0xa6   :  { %2264 = vmatprep.subr.bf16.mxu1 %v2584_v52 }
  0xa7   :  { %1294 = vmatpush1.bf16.msra.mxu0 %v2505_v22 }
  0xa8   :  { %1295 = vmatprep.subr.bf16.mxu0 %v2511_v23 }
  0xab   :  { %1296 = vmatpush1.bf16.msra.mxu0 %v2509_v24 }
  0xac   :  { %1297 = vmatprep.subr.bf16.mxu0 %v2515_v25 }
  0xaf   :  { %1298 = vmatpush1.bf16.msra.mxu0 %v2513_v26 }
  0xb0   :  { %1299 = vmatprep.subr.bf16.mxu0 %v2518_v27 }
  0xb3   :  { %1300 = vmatpush1.bf16.msra.mxu0 %v2516_v28 }
  0xb4   :  { %1301 = vmatprep.subr.bf16.mxu0 %v2521_v29 }
  0xb7   :  { %1302 = vmatpush1.bf16.msra.mxu0 %v2519_v30 }
  0xb8   :  { %1303 = vmatprep.subr.bf16.mxu0 %v2524_v31 }
  0xbb   :  { %1304 = vmatpush1.bf16.msra.mxu0 %v2522_v32 }
  0xbc   :  { %1305 = vmatprep.subr.bf16.mxu0 %v2527_v33  ;;  %v259_v33 = vsub.s32 0, %v258_v7 }
  0xbf   :  { %1306 = vmatpush1.bf16.msra.mxu0 %v2525_v34  ;;  %v263_v34 = vsub.s32 1, %v258_v7  ;;  %v2095_v7 = vld [vmem:[%s3302_s4] ss:$0 sm:$0xff] }
  0xc0   :  { %1316 = vmatprep.subr.bf16.mxu0 %v2530_v35  ;;  %v260_v35 = vrot.slane %v255_v9, %v259_v33 }
  0xc2   :  { %1308 = vmatmul.mubr.bf16.vlgmr.msra.gmra.mrb[0].mxu0 %v2957_v49  ;;  %v2546_v49 = vld [vmem:[%s3297_s1 + $0x510] ss:$12 sps:$4 sm:$0xff]  }
  0xc3   :  { %1317 = vmatpush1.bf16.msra.mxu0 %v2528_v36  ;;  %1348 = vmatprep.mubr.bf16.mxu0 %v2586_v39  ;;  %v264_v36 = vrot.slane %v255_v9, %v263_v34 }
  0xc4   :  { %1318 = vmatprep.subr.bf16.mxu0 %v2533_v37 }
  0xc7   :  { %1319 = vmatpush1.bf16.msra.mxu0 %v2531_v38 }
  0xc8   :  { %1320 = vmatprep.subr.bf16.mxu0 %v2536_v40 }
  0xcb   :  { %1321 = vmatpush1.bf16.msra.mxu0 %v2534_v41 }
  0xcc   :  { %1322 = vmatprep.subr.bf16.mxu0 %v2539_v42 }
  0xcf   :  { %1323 = vmatpush1.bf16.msra.mxu0 %v2537_v43 }
  0xd0   :  { %1324 = vmatprep.subr.bf16.mxu0 %v2542_v44 }
  0xd3   :  { %1325 = vmatpush1.bf16.msra.mxu0 %v2540_v45 }
  0xd4   :  { %1326 = vmatprep.subr.bf16.mxu0 %v2545_v46  ;;  %v2568_v46 = vld [vmem:[%s3299_s3 + $0x80] sm:$0xff]  }
  0xd7   :  { %1327 = vmatpush1.bf16.msra.mxu0 %v2543_v47 }
  0xd8   :  { %1328 = vmatprep.subr.bf16.mxu0 %v2548_v48  ;;  %v2569_v48 = vld [vmem:[%s3299_s3 + $0x88] sm:$0xff]  }
  0xdb   :  { %1329 = vmatpush1.bf16.msra.mxu0 %v2546_v49  ;;  %v2570_v49 = vld [vmem:[%s3299_s3 + $0x90] sm:$0xff]  }
  0xdc   :  { %1330 = vmatprep.subr.bf16.mxu0 %v2551_v50  ;;  %v2571_v50 = vld [vmem:[%s3299_s3 + $0x98] sm:$0xff]  }
  0xdf   :  { %1331 = vmatpush1.bf16.msra.mxu0 %v2549_v51  ;;  %v2572_v51 = vld [vmem:[%s3299_s3 + $0xa0] sm:$0xff]  }
  0xe2   :  { %1349 = vmatmul.mubr.bf16.vlgmr.msra.gmra.mrb[0].mxu0 %v3047_v11 }
  0xf9   :  { %v2145_v1 = vpop.f32.mrb[0].mxu1 }
  0xfa   :  { %v2146_v2 = vpop.f32.mrb[1].mxu1 }
  0xfb   :  { %v2147_v3 = vadd.f32 %v2146_v2, %v2145_v1  ;;  %v2148_v4 = vpop.f32.mrb[2].mxu1  ;;  %v2583_v1 = vld [vmem:[%s3301_s5 + $0x38] sm:$0xff]  }
  0xfc   :  { %v2149_v5 = vpop.f32.mrb[3].mxu1 }
  0xfd   :  { %v1392_v11 = vadd.f32 %v2147_v3, %v268_v10 }
 0x11a   :  { %v2167_v12 = vpop.f32.mrb[4].mxu1 }
 0x11b   :  { %v2168_v13 = vpop.f32.mrb[5].mxu1 }
 0x11c   :  { %v2169_v14 = vadd.f32 %v2168_v13, %v2167_v12  ;;  %v2170_v15 = vpop.f32.mrb[6].mxu1 }
 0x11d   :  { %v2171_v16 = vpop.f32.mrb[7].mxu1  ;;  %v2120_v15 = vld [vmem:[%s3303_s6] ss:$0 sm:$0xff] }
 0x11e   :  { %v1432_v17 = vadd.f32 %v2169_v14, %v1392_v11 }
 0x13a   :  { %v2189_v22 = vpop.f32.mrb[8].mxu1 }
 0x13b   :  { %v2190_v23 = vpop.f32.mrb[9].mxu1 }
 0x13c   :  { %v2191_v24 = vadd.f32 %v2190_v23, %v2189_v22  ;;  %v2192_v25 = vpop.f32.mrb[10].mxu1 }
 0x13d   :  { %v2193_v26 = vpop.f32.mrb[11].mxu1 }
 0x13e   :  { %v1472_v27 = vadd.f32 %v2191_v24, %v1432_v17 }
 0x15a   :  { %v1511_v28 = vpop.f32.mrb[12].mxu1 }
 0x15b   :  { %v1512_v29 = vadd.f32 %v1511_v28, %v1472_v27  ;;  %v2262_v30 = vpop.f32.mrb[13].mxu1 }
 0x15c   :  { %v1514_v31 = vpop.f32.mrb[14].mxu1 }
 0x15d   :  { %v2263_v32 = vpop.f32.mrb[15].mxu1  ;;  %v1519_v56 = vmax.f32 %v1512_v29, 0.0 }
 0x15f   :  { %v1522_v57 = vpack.c.bf16 %v1519_v56, %v1519_v56 }
 0x1b5   :  { %v1350_v37 = vpop.f32.mrb[0].mxu0 }
 0x1b6   :  { %v2304_v38 = vadd.f32 %v1350_v37, %v260_v35  ;;  %v1352_v39 = vpop.f32.mrb[1].mxu0 }
 0x1b7   :  { %v2305_v40 = vadd.f32 %v1352_v39, %v264_v36  ;;  %v1354_v41 = vpop.f32.mrb[2].mxu0 }
 0x1b8   :  { %v1517_v42 = vmax.f32 %v2304_v38, 0.0  ;;  %v1355_v43 = vpop.f32.mrb[3].mxu0 }
 0x1b9   :  { %v1518_v44 = vmax.f32 %v2305_v40, 0.0 }
 0x1ba   :  { %v1520_v47 = vpack.c.bf16 %v1517_v42, %v1517_v42 }
 0x1bb   :  { %v1521_v45 = vpack.c.bf16 %v1518_v44, %v1518_v44 }
 0x1bd   :  { %1754 = vmatprep.mubr.bf16.mxu1 %v1521_v45 }
 0x1be   :  { %1755 = vmatmul.mubr.bf16.vlgmr.msra.gmra.mrb[16].mxu1 %v1520_v47 }
 0x1bf   :  { %2265 = vmatpush3.bf16.msra.mxu1 %v2568_v46  ;;  %2280 = vmatprep.mubr.msk.bf16.mxu1 %vm2585_vm0, %v2584_v52 }
 0x1c0   :  { %2266 = vmatprep.subr.bf16.mxu1 %v2584_v52 }
 0x1c3   :  { %2267 = vmatpush3.bf16.msra.mxu1 %v2569_v48 }
 0x1c4   :  { %2268 = vmatprep.subr.bf16.mxu1 %v2584_v52 }
 0x1c7   :  { %2269 = vmatpush3.bf16.msra.mxu1 %v2570_v49 }
 0x1c8   :  { %2270 = vmatprep.subr.bf16.mxu1 %v2584_v52 }
 0x1cb   :  { %2271 = vmatpush3.bf16.msra.mxu1 %v2571_v50 }
 0x1cc   :  { %2272 = vmatprep.subr.bf16.mxu1 %v2584_v52 }
 0x1cf   :  { %2273 = vmatpush3.bf16.msra.mxu1 %v2572_v51 }
 0x1d0   :  { %2274 = vmatprep.subr.bf16.mxu1 %v2584_v52 }
 0x1d3   :  { %2275 = vmatpush3.bf16.msra.mxu1 %v2573_v53 }
 0x1d4   :  { %2276 = vmatprep.subr.bf16.mxu1 %v2584_v52 }
 0x1d7   :  { %2277 = vmatpush3.bf16.msra.mxu1 %v2574_v54 }
 0x1d8   :  { %2278 = vmatprep.subr.bf16.mxu1 %v2584_v52 }
 0x1db   :  { %2279 = vmatpush3.bf16.msra.mxu1 %v2575_v55 }
 0x1dc   :  { %2284 = vmatprep.subr.bf16.mxu1 %v2584_v52 }
 0x1de   :  { %2281 = vmatmul.mubr.bf16.vlgmr.msra.gmra.mrb[20].mxu1 %v1522_v57 }
 0x1df   :  { %2300 = vmatprep.mubr.msk.bf16.mxu1 %vm2585_vm0, %v2584_v52  ;;  %2285 = vmatpush3.bf16.msra.mxu1 %v2576_v58 }
 0x1e0   :  { %2286 = vmatprep.subr.bf16.mxu1 %v2584_v52 }
 0x1e3   :  { %2287 = vmatpush3.bf16.msra.mxu1 %v2577_v59 }
 0x1e4   :  { %2288 = vmatprep.subr.bf16.mxu1 %v2584_v52 }
 0x1e7   :  { %2289 = vmatpush3.bf16.msra.mxu1 %v2578_v60 }
 0x1e8   :  { %2290 = vmatprep.subr.bf16.mxu1 %v2584_v52 }
 0x1eb   :  { %2291 = vmatpush3.bf16.msra.mxu1 %v2579_v61 }
 0x1ec   :  { %2292 = vmatprep.subr.bf16.mxu1 %v2584_v52 }
 0x1ef   :  { %2293 = vmatpush3.bf16.msra.mxu1 %v2580_v62 }
 0x1f0   :  { %2294 = vmatprep.subr.bf16.mxu1 %v2584_v52 }
 0x1f3   :  { %2295 = vmatpush3.bf16.msra.mxu1 %v2581_v63 }
 0x1f4   :  { %2296 = vmatprep.subr.bf16.mxu1 %v2584_v52 }
 0x1f7   :  { %2297 = vmatpush3.bf16.msra.mxu1 %v2582_v0 }
 0x1f8   :  { %2298 = vmatprep.subr.bf16.mxu1 %v2584_v52 }
 0x1fb   :  { %2299 = vmatpush3.bf16.msra.mxu1 %v2583_v1 }
 0x291   :  { %v2220_v2 = vpop.f32.mrb[16].mxu1 }
 0x292   :  { %v2221_v3 = vpop.f32.mrb[17].mxu1 }
 0x293   :  { %v2222_v4 = vadd.f32 %v2221_v3, %v2220_v2  ;;  %v2223_v5 = vpop.f32.mrb[18].mxu1 }
 0x294   :  { %v2224_v6 = vpop.f32.mrb[19].mxu1 }
 0x295   :  { %v1757_v8 = vadd.f32 %v2222_v4, %v2095_v7 }
 0x2b1   :  { %v1796_v9 = vpop.f32.mrb[20].mxu1 }
 0x2b2   :  { %v1797_v10 = vadd.f32 %v1796_v9, %v1757_v8  ;;  %v2282_v11 = vpop.f32.mrb[21].mxu1 }
 0x2b3   :  { %v1799_v12 = vpop.f32.mrb[22].mxu1 }
 0x2b4   :  { %v1802_v52 = vmax.f32 %v1797_v10, 0.0  ;;  %v2283_v13 = vpop.f32.mrb[23].mxu1 }
 0x2b6   :  { %v1803_v14 = vpack.c.bf16 %v1802_v52, %v1802_v52 }
 0x2b8   :  { %2301 = vmatmul.mubr.bf16.vlgmr.msra.gmra.mrb[24].mxu1 %v1803_v14 }
 0x38b   :  { %v1909_v16 = vpop.f32.mrb[24].mxu1 }
 0x38c   :  { %v1910_v17 = vadd.f32 %v2120_v15, %v1909_v16  ;;  %v2302_v18 = vpop.f32.mrb[25].mxu1 }
 0x38d   :  { %v1912_v19 = vpop.f32.mrb[26].mxu1 }
 0x38e   :  { %1915 = vst [vmem:[%s3304_s7] sm:$0xff] %v1910_v17  ;;  %v2303_v20 = vpop.f32.mrb[27].mxu1 }

</bundles_post_ra>
